<compile_context>
chip_gen: v7x
topology: tpu7x:2x2x1
jax: 0.10.0
libtpu: 0.0.40
codegen_flags: <defaults>
</compile_context>

<pallas_src>
import functools

import jax
import jax.numpy as jnp
from jax import lax
from jax.experimental import pallas as pl
from jax.experimental.pallas import tpu as pltpu

_EPS = 1e-5
_C1 = 100      # conv_layer_input output channels
_C2 = 50       # conv_layer_hidden output channels
_HALO = 128    # lane-aligned halo block fetched from the next time tile
_NT_DIMS = (((1,), (1,)), ((), ()))   # A @ B.T without materializing a transpose


def _round_up(x: int, m: int) -> int:
    return ((x + m - 1) // m) * m


# ---------------------------------------------------------------------------
# Kernels
# ---------------------------------------------------------------------------
def _im2col_conv1_tanh(xa_ref, xb_ref, w1_ref, b1_ref, filter_size: int, time_tile: int):
    """h1 = tanh(conv_layer_input(x)) for one (batch, time-tile) block.

    xa_ref: [C_in, TT] current time block; xb_ref: [C_in, 128] halo block.
    w1_ref: [C1, K*C_in] (tap-major rows); b1_ref: [C1, 1]. Returns [C1, TT] f32.
    """
    xcat = jnp.concatenate([xa_ref[...], xb_ref[...]], axis=-1)          # [C, TT+128]
    cols = jnp.concatenate(
        [xcat[:, k:k + time_tile] for k in range(filter_size)], axis=0)   # [K*C, TT]
    acc = jnp.dot(w1_ref[...], cols, preferred_element_type=jnp.float32)  # single matmul
    return jnp.tanh(acc + b1_ref[...])


def _make_encoder_kernel(filter_size: int, time_tile: int):
    def kernel(xa_ref, xb_ref, w1_ref, b1_ref, w2_ref, b2_ref, w3_ref, b3_ref, o_ref):
        h1 = _im2col_conv1_tanh(xa_ref, xb_ref, w1_ref, b1_ref, filter_size, time_tile)
        h2 = jnp.tanh(jnp.dot(w2_ref[...], h1, preferred_element_type=jnp.float32)
                      + b2_ref[...])
        out = jnp.dot(w3_ref[...], h2, preferred_element_type=jnp.float32) + b3_ref[...]
        o_ref[...] = out.astype(o_ref.dtype)
    return kernel


def _make_decoder_kernel(filter_size: int, time_tile: int):
    # BN1 / conv2 / BN2 / conv3 are all folded into one [out_dim, C1] matmul.
    def kernel(xa_ref, xb_ref, w1_ref, b1_ref, w32_ref, b32_ref, o_ref):
        h1 = _im2col_conv1_tanh(xa_ref, xb_ref, w1_ref, b1_ref, filter_size, time_tile)
        out = jnp.dot(w32_ref[...], h1, preferred_element_type=jnp.float32) + b32_ref[...]
        o_ref[...] = out.astype(o_ref.dtype)
    return kernel


def _make_stats_kernel(filter_size: int, time_tile: int, l_out: int, needs_mask: bool):
    """Per-batch channel sums and Gram matrix of h1, accumulated across time tiles."""
    def kernel(xa_ref, xb_ref, w1_ref, b1_ref, sum_ref, gram_ref):
        j = pl.program_id(1)
        h1 = _im2col_conv1_tanh(xa_ref, xb_ref, w1_ref, b1_ref, filter_size, time_tile)

        @pl.when(j == 0)
        def _():
            sum_ref[...] = jnp.zeros_like(sum_ref)
            gram_ref[...] = jnp.zeros_like(gram_ref)

        def accum(h):
            sum_ref[...] += jnp.sum(h, axis=-1, keepdims=True)
            gram_ref[...] += lax.dot_general(
                h, h, dimension_numbers=_NT_DIMS, preferred_element_type=jnp.float32)

        if needs_mask:
            # Padded time columns only exist in the last tile; interior tiles
            # accumulate h1 directly.
            is_last = j == pl.num_programs(1) - 1

            @pl.when(jnp.logical_not(is_last))
            def _():
                accum(h1)

            @pl.when(is_last)
            def _():
                col = lax.broadcasted_iota(jnp.int32, h1.shape, 1) + j * time_tile
                accum(jnp.where(col < l_out, h1, 0.0))
        else:
            accum(h1)
    return kernel


# ---------------------------------------------------------------------------
# Wrapper
# ---------------------------------------------------------------------------
def generator_forward(x, params, flag: str, *, time_tile=None):
    """x: [B, input_dim, seq_len] float32 (PyTorch NCL). Returns [B, output_dim, L_out]."""
    if flag not in {"encoder", "decoder"}:
        raise ValueError("flag can only be encoder or decoder")

    w1, b1, w2, b2, w3, b3 = params           # torch conv layouts: w = [out, in, k]
    B, C, L = x.shape
    C1, _, K = w1.shape                        # (100, input_dim, filter_size)
    C2 = w2.shape[0]                           # 50
    out_dim = w3.shape[0]
    L_out = L - K + 1
    if L_out < 1:
        raise ValueError("seq_len must be >= filter_size")
    if K - 1 > _HALO:
        raise ValueError("filter_size - 1 must not exceed the 128-column halo")

    if time_tile is None:
        time_tile = min(1024, _round_up(L_out, 128))
    nt = int(pl.cdiv(L_out, time_tile))
    l_out_pad = nt * time_tile
    l_x_pad = l_out_pad + _HALO                # +128 columns so the halo block exists

    x_pad = jnp.pad(x.astype(jnp.float32), ((0, 0), (0, 0), (0, l_x_pad - L)))

    # Channel-major weights for the [C_out, C_in] @ [C_in, TT] matmul layout.
    # conv1 is reshaped tap-major so im2col needs a single matmul: rows k*C + c.
    w1f = jnp.transpose(w1, (0, 2, 1)).reshape(C1, K * C).astype(jnp.float32)  # [C1, K*C]
    w2t = w2[:, :, 0].astype(jnp.float32)                                      # [C2, C1]
    w3t = w3[:, :, 0].astype(jnp.float32)                                      # [out, C2]
    b1c = b1.astype(jnp.float32)
    b2c = b2.astype(jnp.float32)
    b3c = b3.astype(jnp.float32)

    grid = (B, nt)
    halo_blocks = time_tile // _HALO
    x_cur_spec = pl.BlockSpec((None, C, time_tile), lambda b, j: (b, 0, j))
    x_halo_spec = pl.BlockSpec((None, C, _HALO), lambda b, j: (b, 0, (j + 1) * halo_blocks))
    w1_spec = pl.BlockSpec((C1, K * C), lambda b, j: (0, 0))

    def full2d(shape):
        return pl.BlockSpec(shape, lambda b, j: (0, 0))

    input_bytes = 4 * B * nt * (time_tile + _HALO) * C

    if flag == "decoder":
        # Pass 1: per-batch channel sums + Gram matrix of h1, accumulated in-kernel
        # across time tiles (time axis "arbitrary", batch axis "parallel").
        stats_cost = pl.CostEstimate(
            flops=int(2 * B * l_out_pad * (K * C * C1 + C1 * C1)),
            transcendentals=int(B * l_out_pad * C1),
            bytes_accessed=int(input_bytes + 4 * (C1 * K * C + C1 + B * (C1 * C1 + C1))))
        sum_parts, gram_parts = pl.pallas_call(
            _make_stats_kernel(K, time_tile, L_out, needs_mask=(l_out_pad != L_out)),
            out_shape=(jax.ShapeDtypeStruct((B, C1, 1), jnp.float32),
                       jax.ShapeDtypeStruct((B, C1, C1), jnp.float32)),
            grid=grid,
            in_specs=[x_cur_spec, x_halo_spec, w1_spec, full2d((C1, 1))],
            out_specs=(pl.BlockSpec((None, C1, 1), lambda b, j: (b, 0, 0)),
                       pl.BlockSpec((None, C1, C1), lambda b, j: (b, 0, 0))),
            compiler_params=pltpu.CompilerParams(
                dimension_semantics=("parallel", "arbitrary")),
            cost_estimate=stats_cost,
        )(x_pad, x_pad, w1f, b1c.reshape(-1, 1))

        m = float(B * L_out)
        mean1 = jnp.sum(sum_parts, axis=0)[:, 0] / m                   # [C1]
        gram = jnp.sum(gram_parts, axis=0)                             # [C1, C1]
        cov1 = gram / m - jnp.outer(mean1, mean1)                      # biased covariance
        r1 = lax.rsqrt(jnp.maximum(jnp.diag(cov1), 0.0) + _EPS)        # BN1 inv-std
        # Fold BN1 (post-tanh) into conv_layer_hidden.
        w2_run = w2t * r1[None, :]
        b2_run = b2c - w2_run @ mean1
        # Exact training-mode stats of h2 = w2_run @ h1 + b2_run: mean2 == b2,
        # var2 = diag(W2' Cov(h1) W2'^T) because conv_layer_hidden is linear.
        var2 = jnp.sum((w2_run @ cov1) * w2_run, axis=1)
        r2 = lax.rsqrt(jnp.maximum(var2, 0.0) + _EPS)                  # BN2 inv-std
        w3_run = w3t * r2[None, :]
        b3_run = b3c - w3_run @ b2c
        # No nonlinearity between the folded conv2 and conv3 => fold them together.
        w32 = w3_run @ w2_run                                          # [out_dim, C1]
        b32 = w3_run @ b2_run + b3_run                                 # [out_dim]

        kernel = _make_decoder_kernel(K, time_tile)
        weights = [w32, b32.reshape(-1, 1)]
        weight_specs = [full2d((out_dim, C1)), full2d((out_dim, 1))]
        flops = 2 * B * l_out_pad * (K * C * C1 + C1 * out_dim)
        transc = B * l_out_pad * C1
    else:
        kernel = _make_encoder_kernel(K, time_tile)
        weights = [w2t, b2c.reshape(-1, 1), w3t, b3c.reshape(-1, 1)]
        weight_specs = [full2d((C2, C1)), full2d((C2, 1)),
                        full2d((out_dim, C2)), full2d((out_dim, 1))]
        flops = 2 * B * l_out_pad * (K * C * C1 + C1 * C2 + C2 * out_dim)
        transc = B * l_out_pad * (C1 + C2)

    main_cost = pl.CostEstimate(
        flops=int(flops), transcendentals=int(transc),
        bytes_accessed=int(input_bytes + 4 * (C1 * K * C + C1
                                              + sum(int(w.size) for w in weights)
                                              + B * l_out_pad * out_dim)))
    out_pad = pl.pallas_call(
        kernel,
        out_shape=jax.ShapeDtypeStruct((B, out_dim, l_out_pad), jnp.float32),
        grid=grid,
        in_specs=[x_cur_spec, x_halo_spec, w1_spec, full2d((C1, 1))] + weight_specs,
        out_specs=pl.BlockSpec((None, out_dim, time_tile), lambda b, j: (b, 0, j)),
        compiler_params=pltpu.CompilerParams(
            dimension_semantics=("parallel", "parallel")),
        cost_estimate=main_cost,
    )(x_pad, x_pad, w1f, b1c.reshape(-1, 1), *weights)

    return out_pad[:, :, :L_out]                                       # [B, out_dim, L_out]


# ---------------------------------------------------------------------------
# Deterministic parameter init (matches PyTorch shapes / init schemes)
# ---------------------------------------------------------------------------
def _xavier_uniform_conv1d(key, out_ch, in_ch, k):
    fan_in, fan_out = in_ch * k, out_ch * k
    bound = (6.0 / (fan_in + fan_out)) ** 0.5
    return jax.random.uniform(key, (out_ch, in_ch, k), jnp.float32, -bound, bound)


def _conv_bias(key, out_ch, in_ch, k):
    bound = 1.0 / (in_ch * k) ** 0.5
    return jax.random.uniform(key, (out_ch,), jnp.float32, -bound, bound)


def init_generator_params(key, input_dim, output_dim, filter_size):
    ks = jax.random.split(key, 6)
    w1 = _xavier_uniform_conv1d(ks[0], _C1, input_dim, filter_size)
    b1 = _conv_bias(ks[1], _C1, input_dim, filter_size)
    w2 = _xavier_uniform_conv1d(ks[2], _C2, _C1, 1)
    b2 = _conv_bias(ks[3], _C2, _C1, 1)
    w3 = _xavier_uniform_conv1d(ks[4], output_dim, _C2, 1)
    b3 = _conv_bias(ks[5], output_dim, _C2, 1)
    return (w1, b1, w2, b2, w3, b3)


# ---------------------------------------------------------------------------
# Pure-JAX reference (same math, used for the correctness check)
# ---------------------------------------------------------------------------
def _reference_forward(x, params, flag):
    w1, b1, w2, b2, w3, b3 = params
    eps = 1e-5

    def conv1d(inp, w, b):  # inp [B, Cin, L], w [Cout, Cin, Kk]
        Kk = w.shape[2]
        Lo = inp.shape[2] - Kk + 1
        cols = jnp.stack([inp[:, :, k:k + Lo] for k in range(Kk)], axis=-1)  # [B,Cin,Lo,Kk]
        return jnp.einsum("bclk,ock->bol", cols, w) + b[None, :, None]

    def bn(h):  # h [B, Ch, Lo], training-mode BatchNorm1d with gamma=1, beta=0
        mean = jnp.mean(h, axis=(0, 2), keepdims=True)
        var = jnp.mean((h - mean) ** 2, axis=(0, 2), keepdims=True)
        return (h - mean) * lax.rsqrt(var + eps)

    h = jnp.tanh(conv1d(x, w1, b1))
    if flag == "encoder":
        h = jnp.tanh(conv1d(h, w2, b2))
    else:
        h = bn(h)
        h = bn(conv1d(h, w2, b2))
    return conv1d(h, w3, b3)


# ---------------------------------------------------------------------------
if __name__ == "__main__":
    key = jax.random.PRNGKey(0)
    k_param, k_x = jax.random.split(key)

    batch, input_dim, output_dim, filter_size, seq_len = 2, 4, 4, 3, 16
    params = init_generator_params(k_param, input_dim, output_dim, filter_size)
    x = jax.random.normal(k_x, (batch, input_dim, seq_len), jnp.float32)

    ok = True
    for flag in ("encoder", "decoder"):
        fwd = jax.jit(functools.partial(generator_forward, flag=flag))
        out = jax.block_until_ready(fwd(x, params))
        ref = _reference_forward(x, params, flag)
        assert out.shape == (batch, output_dim, seq_len - filter_size + 1)
        ok = ok and bool(jnp.allclose(out, ref, atol=1e-3, rtol=1e-3))

    if ok:
        print("KERNEL_OK")
</pallas_src>

<mosaic_0001>
module attributes {stable_mosaic.version = 11 : i64} {
  func.func @kernel(%arg0: i32, %arg1: i32, %arg2: memref<1x4x128xf32, #tpu.memory_space<vmem>>, %arg3: memref<1x4x128xf32, #tpu.memory_space<vmem>>, %arg4: memref<100x12xf32, #tpu.memory_space<vmem>>, %arg5: memref<100x1xf32, #tpu.memory_space<vmem>>, %arg6: memref<50x100xf32, #tpu.memory_space<vmem>>, %arg7: memref<50x1xf32, #tpu.memory_space<vmem>>, %arg8: memref<4x50xf32, #tpu.memory_space<vmem>>, %arg9: memref<4x1xf32, #tpu.memory_space<vmem>>, %arg10: memref<1x4x128xf32, #tpu.memory_space<vmem>>) attributes {dimension_semantics = [#tpu.dimension_semantics<parallel>, #tpu.dimension_semantics<parallel>], iteration_bounds = array<i64: 2, 1>, scalar_prefetch = 0 : i64, scratch_operands = 0 : i64, tpu.core_type = #tpu.core_type<tc>, window_params = [{transform_indices = @transform_0, window_bounds = array<i64: 1, 4, 128>}, {transform_indices = @transform_1, window_bounds = array<i64: 1, 4, 128>}, {pipeline_mode = #tpu.pipeline_mode<synchronous>, transform_indices = @transform_2, window_bounds = array<i64: 100, 12>}, {pipeline_mode = #tpu.pipeline_mode<synchronous>, transform_indices = @transform_3, window_bounds = array<i64: 100, 1>}, {pipeline_mode = #tpu.pipeline_mode<synchronous>, transform_indices = @transform_4, window_bounds = array<i64: 50, 100>}, {pipeline_mode = #tpu.pipeline_mode<synchronous>, transform_indices = @transform_5, window_bounds = array<i64: 50, 1>}, {pipeline_mode = #tpu.pipeline_mode<synchronous>, transform_indices = @transform_6, window_bounds = array<i64: 4, 50>}, {pipeline_mode = #tpu.pipeline_mode<synchronous>, transform_indices = @transform_7, window_bounds = array<i64: 4, 1>}, {transform_indices = @transform_8, window_bounds = array<i64: 1, 4, 128>}]} {
    %c0 = arith.constant 0 : index
    %c0_0 = arith.constant 0 : index
    %c0_1 = arith.constant 0 : index
    %0 = vector.load %arg2[%c0, %c0_0, %c0_1] : memref<1x4x128xf32, #tpu.memory_space<vmem>>, vector<1x4x128xf32>
    %1 = vector.shape_cast %0 : vector<1x4x128xf32> to vector<4x128xf32>
    %c0_2 = arith.constant 0 : index
    %c0_3 = arith.constant 0 : index
    %c0_4 = arith.constant 0 : index
    %2 = vector.load %arg3[%c0_2, %c0_3, %c0_4] : memref<1x4x128xf32, #tpu.memory_space<vmem>>, vector<1x4x128xf32>
    %3 = vector.shape_cast %2 : vector<1x4x128xf32> to vector<4x128xf32>
    %4 = tpu.concatenate %1, %3 in 1 : vector<4x128xf32>, vector<4x128xf32> -> vector<4x256xf32>
    %5 = vector.extract_strided_slice %4 {offsets = [0, 0], sizes = [4, 128], strides = [1, 1]} : vector<4x256xf32> to vector<4x128xf32>
    %6 = vector.extract_strided_slice %4 {offsets = [0, 1], sizes = [4, 128], strides = [1, 1]} : vector<4x256xf32> to vector<4x128xf32>
    %7 = vector.extract_strided_slice %4 {offsets = [0, 2], sizes = [4, 128], strides = [1, 1]} : vector<4x256xf32> to vector<4x128xf32>
    %8 = tpu.concatenate %5, %6, %7 in 0 : vector<4x128xf32>, vector<4x128xf32>, vector<4x128xf32> -> vector<12x128xf32>
    %c0_5 = arith.constant 0 : index
    %c0_6 = arith.constant 0 : index
    %9 = vector.load %arg4[%c0_5, %c0_6] : memref<100x12xf32, #tpu.memory_space<vmem>>, vector<100x12xf32>
    %cst = arith.constant dense<0.000000e+00> : vector<100x128xf32>
    %10 = tpu.matmul %9, %8, %cst {dimension_numbers = #tpu.dot_dimension_numbers<[1], [0], [0], [1], [0, 0, 1, 1], [], []>} : vector<100x12xf32>, vector<12x128xf32>, vector<100x128xf32> -> vector<100x128xf32>
    %c0_7 = arith.constant 0 : index
    %c0_8 = arith.constant 0 : index
    %11 = vector.load %arg5[%c0_7, %c0_8] : memref<100x1xf32, #tpu.memory_space<vmem>>, vector<100x1xf32>
    %12 = vector.broadcast %11 : vector<100x1xf32> to vector<100x128xf32>
    %13 = arith.addf %10, %12 : vector<100x128xf32>
    %14 = math.tanh %13 : vector<100x128xf32>
    %c0_9 = arith.constant 0 : index
    %c0_10 = arith.constant 0 : index
    %15 = vector.load %arg6[%c0_9, %c0_10] : memref<50x100xf32, #tpu.memory_space<vmem>>, vector<50x100xf32>
    %cst_11 = arith.constant dense<0.000000e+00> : vector<50x128xf32>
    %16 = tpu.matmul %15, %14, %cst_11 {dimension_numbers = #tpu.dot_dimension_numbers<[1], [0], [0], [1], [0, 0, 1, 1], [], []>} : vector<50x100xf32>, vector<100x128xf32>, vector<50x128xf32> -> vector<50x128xf32>
    %c0_12 = arith.constant 0 : index
    %c0_13 = arith.constant 0 : index
    %17 = vector.load %arg7[%c0_12, %c0_13] : memref<50x1xf32, #tpu.memory_space<vmem>>, vector<50x1xf32>
    %18 = vector.broadcast %17 : vector<50x1xf32> to vector<50x128xf32>
    %19 = arith.addf %16, %18 : vector<50x128xf32>
    %20 = math.tanh %19 : vector<50x128xf32>
    %c0_14 = arith.constant 0 : index
    %c0_15 = arith.constant 0 : index
    %21 = vector.load %arg8[%c0_14, %c0_15] : memref<4x50xf32, #tpu.memory_space<vmem>>, vector<4x50xf32>
    %cst_16 = arith.constant dense<0.000000e+00> : vector<4x128xf32>
    %22 = tpu.matmul %21, %20, %cst_16 {dimension_numbers = #tpu.dot_dimension_numbers<[1], [0], [0], [1], [0, 0, 1, 1], [], []>} : vector<4x50xf32>, vector<50x128xf32>, vector<4x128xf32> -> vector<4x128xf32>
    %c0_17 = arith.constant 0 : index
    %c0_18 = arith.constant 0 : index
    %23 = vector.load %arg9[%c0_17, %c0_18] : memref<4x1xf32, #tpu.memory_space<vmem>>, vector<4x1xf32>
    %24 = vector.broadcast %23 : vector<4x1xf32> to vector<4x128xf32>
    %25 = arith.addf %22, %24 : vector<4x128xf32>
    %c0_19 = arith.constant 0 : index
    %c0_20 = arith.constant 0 : index
    %c0_21 = arith.constant 0 : index
    %26 = vector.load %arg10[%c0_19, %c0_20, %c0_21] : memref<1x4x128xf32, #tpu.memory_space<vmem>>, vector<1x4x128xf32>
    %27 = vector.shape_cast %26 : vector<1x4x128xf32> to vector<4x128xf32>
    %28 = vector.shape_cast %25 : vector<4x128xf32> to vector<1x4x128xf32>
    tpu.vector_store %arg10[%c0_19, %c0_20, %c0_21], %28 {strides = array<i32>} : memref<1x4x128xf32, #tpu.memory_space<vmem>>, vector<1x4x128xf32>,
    return
  }
  func.func @transform_0(%arg0: i32, %arg1: i32) -> (i32, i32, i32) {
    %c0_i32 = arith.constant 0 : i32
    %c0_i32_0 = arith.constant 0 : i32
    return %arg0, %c0_i32, %arg1 : i32, i32, i32
  }
  func.func @transform_1(%arg0: i32, %arg1: i32) -> (i32, i32, i32) {
    %c1_i32 = arith.constant 1 : i32
    %0 = arith.addi %arg1, %c1_i32 : i32
    %c1_i32_0 = arith.constant 1 : i32
    %1 = arith.muli %0, %c1_i32_0 : i32
    %c0_i32 = arith.constant 0 : i32
    %c0_i32_1 = arith.constant 0 : i32
    return %arg0, %c0_i32, %1 : i32, i32, i32
  }
  func.func @transform_2(%arg0: i32, %arg1: i32) -> (i32, i32) {
    %c0_i32 = arith.constant 0 : i32
    %c0_i32_0 = arith.constant 0 : i32
    %c0_i32_1 = arith.constant 0 : i32
    return %c0_i32, %c0_i32_0 : i32, i32
  }
  func.func @transform_3(%arg0: i32, %arg1: i32) -> (i32, i32) {
    %c0_i32 = arith.constant 0 : i32
    %c0_i32_0 = arith.constant 0 : i32
    %c0_i32_1 = arith.constant 0 : i32
    return %c0_i32, %c0_i32_0 : i32, i32
  }
  func.func @transform_4(%arg0: i32, %arg1: i32) -> (i32, i32) {
    %c0_i32 = arith.constant 0 : i32
    %c0_i32_0 = arith.constant 0 : i32
    %c0_i32_1 = arith.constant 0 : i32
    return %c0_i32, %c0_i32_0 : i32, i32
  }
  func.func @transform_5(%arg0: i32, %arg1: i32) -> (i32, i32) {
    %c0_i32 = arith.constant 0 : i32
    %c0_i32_0 = arith.constant 0 : i32
    %c0_i32_1 = arith.constant 0 : i32
    return %c0_i32, %c0_i32_0 : i32, i32
  }
  func.func @transform_6(%arg0: i32, %arg1: i32) -> (i32, i32) {
    %c0_i32 = arith.constant 0 : i32
    %c0_i32_0 = arith.constant 0 : i32
    %c0_i32_1 = arith.constant 0 : i32
    return %c0_i32, %c0_i32_0 : i32, i32
  }
  func.func @transform_7(%arg0: i32, %arg1: i32) -> (i32, i32) {
    %c0_i32 = arith.constant 0 : i32
    %c0_i32_0 = arith.constant 0 : i32
    %c0_i32_1 = arith.constant 0 : i32
    return %c0_i32, %c0_i32_0 : i32, i32
  }
  func.func @transform_8(%arg0: i32, %arg1: i32) -> (i32, i32, i32) {
    %c0_i32 = arith.constant 0 : i32
    %c0_i32_0 = arith.constant 0 : i32
    return %arg0, %c0_i32, %arg1 : i32, i32, i32
  }
}

</mosaic_0001>

<bundles_post_ra>
// kernel: generator_forward.1
= control target key start
LH: loop header
LB: loop body
LE: loop exit
PB: predicated region body
PF: predicated region fallthrough
CT: control target
= control target key end

     0   :  { %13 = vsyncpa [#allocation3], 0  ;;  %s1831_s0 = inlined_call_operand.vmem [shape: f32[2,4,256], index: 0, kind: input, shape index: {}, may-alias: {0,1}]   ;;  %s1832_s1 = inlined_call_operand.vmem [shape: f32[2,4,256], index: 1, kind: input, shape index: {}, may-alias: {0,1}]   ;;  %s1833_s2 = inlined_call_operand.vmem [shape: f32[100,12], index: 2, kind: input, shape index: {}]   ;;  %s1834_s3 = inlined_call_operand.vmem [shape: f32[100,1], index: 3, kind: input, shape index: {}]   ;;  %s1835_s4 = inlined_call_operand.vmem [shape: f32[50,100], index: 4, kind: input, shape index: {}]   ;;  %s1836_s5 = inlined_call_operand.vmem [shape: f32[50,1], index: 5, kind: input, shape index: {}]   ;;  %s1837_s6 = inlined_call_operand.vmem [shape: f32[4,50], index: 6, kind: input, shape index: {}]   ;;  %s1838_s7 = inlined_call_operand.vmem [shape: f32[4,1], index: 7, kind: input, shape index: {}]   ;;  %s1839_s8 = inlined_call_operand.hbm [shape: f32[2,4,128], index: 8, kind: output, shape index: {}]  }
   0x1   :  { %15 = vsyncpa [#allocation3 + $0x1], 0  ;;  %s1508_s27 = smov 0   ;;  %s1510_s28 = smov 0  }
   0x2   :  { %s1512_s29 = smov 0   ;;  %s1514_s30 = smov 0  }
   0x3   :  { %s1516_s9 = smov 0   ;;  %s1518_s10 = smov 0  }
   0x4 LB: > { %s1038_s11 = sadd.s32 4294967295, %s1453_s10   ;;  %s1039_s12 = sadd.s32 4294967294, %s1453_s10   ;;  %s1453_s10 = sphi %s1518_s10, %s21_s10   ;;  %s1449_s9 = sphi %s1516_s9, %s1846_s9   ;;  %s1445_s30 = sphi %s1514_s30, %s1845_s30   ;;  %s1441_s29 = sphi %s1512_s29, %s1844_s29   ;;  %s1437_s28 = sphi %s1510_s28, %s1843_s28   ;;  %s1433_s27 = sphi %s1508_s27, %s1842_s27  }
   0x5   : > { %s33_s13 = sadd.s32 1, %s1449_s9  ;;  %s226_s14 = sadd.s32 1, %s1441_s29 }
   0x6   : > { %p35_p0 = scmp.ge.s32.totalorder %s33_s13, 2  ;;  %p236_p1 = scmp.ne.s32.totalorder %s1441_s29, %s1437_s28 }
   0x7   : > { %p237_p2 = scmp.eq.s32.totalorder %s1038_s11, 1  ;;  %p242_p3 = scmp.ne.s32.totalorder %s1437_s28, %s1433_s27 }
   0x8   : > { %s1848_s13 = smov (%p35_p0, %s33_s13), 0  ;;  %p243_p5 = scmp.eq.s32.totalorder %s1039_s12, 1 }
   0x9   : > { %p1548_p4 = por %p237_p2, %p236_p1  ;;  %s221_s16 = ssub.s32 %s1449_s9, %s1848_s13 }
   0xa   : > { %p1042_p6 = scmp.ge.s32.totalorder %s1453_s10, 1  ;;  %p224_p7 = scmp.eq.s32.totalorder %s221_s16, 0 }
   0xb   : > { %p1555_p8 = por %p243_p5, %p242_p3  ;;  %p303_p9 = scmp.lt.s32.totalorder %s1453_s10, 3 }
   0xc   : > { %s1561_s18 = scalar_select %p224_p7, %s1441_s29, %s226_s14  }
   0xd   : > { %p304_p10 = pnand %p1042_p6, %p303_p9 }
   0xe   : > { %p349_p11 = scmp.lt.s32.totalorder (!%p304_p10), %s1445_s30, 1  ;;  %v1455_v0 = vmov (!%p304_p10), 0.0|0.0   ;;  %vm1456_vm0 = vmmov (!%p304_p10), 0   ;;  %v1457_v5 = vmov (!%p304_p10), 0.0   ;;  %s1458_s12 = smov (!%p304_p10), 127   ;;  %v401_v8 = vld [vmem:[%s1834_s3] sm:$0xff] (!%p304_p10) }
   0xf   : > { %307 = sbr.rel (%p304_p10) target bundleno = 915 (0x393), region = 52  ;;  %1230 = vmatprep.subr.bf16.mxu0 (!%p304_p10), %v1455_v0  ;;  %1234 = vmatprep.subr.bf16.mxu1 (!%p304_p10), %v1455_v0  ;;  %s1459_s14 = smov (!%p304_p10), 126   ;;  %v1460_v9 = vmov (!%p304_p10), 0   ;;  %v403_v10 = vld [vmem:[%s1834_s3 + $0x10] sm:$0xff] (!%p304_p10)  ;;  %v402_v11 = vld [vmem:[%s1834_s3 + $0x8] sm:$0xff] (!%p304_p10)  ;;  %v404_v13 = vld [vmem:[%s1834_s3 + $0x18] sm:$0xff] (!%p304_p10) }
  0x10   : > { %1127 = vmatprep.mubr.msk.f32.mxu0 (!%p304_p10), %vm1456_vm0, %v1457_v5  ;;  %1192 = vmatprep.mubr.msk.f32.mxu1 (!%p304_p10), %vm1456_vm0, %v1457_v5  ;;  %v406_v12 = vld [vmem:[%s1834_s3 + $0x28] sm:$0xff] (!%p304_p10)  ;;  %v408_v14 = vld [vmem:[%s1834_s3 + $0x38] sm:$0xff] (!%p304_p10)  ;;  %v405_v15 = vld [vmem:[%s1834_s3 + $0x20] sm:$0xff] (!%p304_p10)  ;;  %vm377_vm1 = vcmask (!%p304_p10), 1039360   ;;  %vm384_vm2 = vcmask (!%p304_p10), 1031168   ;;  %vm386_vm3 = vcmask (!%p304_p10), 1043456  }
  0x11   : > { %1333 = vset.pattern.permute.xlu1 (!%p304_p10), %v1460_v9  ;;  %1334 = vset.pattern.permute.xlu0 (!%p304_p10), %v1460_v9  ;;  %v410_v16 = vld [vmem:[%s1834_s3 + $0x48] sm:$0xff] (!%p304_p10)  ;;  %v407_v17 = vld [vmem:[%s1834_s3 + $0x30] sm:$0xff] (!%p304_p10)  ;;  %v412_v18 = vld [vmem:[%s1834_s3 + $0x58] sm:$0xff] (!%p304_p10)  ;;  %vm1461_vm4 = vmmov (!%p304_p10), 1   ;;  %vm479_vm6 = vcmask (!%p304_p10), 97280   ;;  %vm713_vm7 = vcmask (!%p304_p10), 818176  }
  0x12   : > { %416 = vperm.xlu1 (!%p304_p10), %1333, %v401_v8   ;;  %v409_v19 = vld [vmem:[%s1834_s3 + $0x40] sm:$0xff] (!%p304_p10)  ;;  %v411_v21 = vld [vmem:[%s1834_s3 + $0x50] sm:$0xff] (!%p304_p10)  ;;  %v672_v25 = vld [vmem:[%s1836_s5 + $0x8] sm:$0xff] (!%p304_p10)  ;;  %vm856_vm8 = vcmask (!%p304_p10), 1041408   ;;  %vm852_vm9 = vcmask (!%p304_p10), 408576   ;;  %s346_s16 = sand.u32 (!%p304_p10), 1, %s1437_s28  }
  0x13   : > { %v671_v20 = vld [vmem:[%s1836_s5] sm:$0xff] (!%p304_p10)  ;;  %v673_v22 = vld [vmem:[%s1836_s5 + $0x10] sm:$0xff] (!%p304_p10)  ;;  %v674_v27 = vld [vmem:[%s1836_s5 + $0x18] sm:$0xff] (!%p304_p10)  ;;  %s932_s26 = scalar_lea.sflag (!%p304_p10), [#allocation3], %s346_s16 }
  0x14   : > { %v413_v23 = vld [vmem:[%s1834_s3 + $0x60] sm:$0xf] (!%p304_p10)  ;;  %v677_v26 = vld [vmem:[%s1836_s5 + $0x30] sm:$0x3] (!%p304_p10)  ;;  %v676_v28 = vld [vmem:[%s1836_s5 + $0x28] sm:$0xff] (!%p304_p10) }
  0x15   : > { %v675_v24 = vld [vmem:[%s1836_s5 + $0x20] sm:$0xff] (!%p304_p10)  ;;  %vm1232_vm5 = vmpackc.low (!%p304_p10), %vm386_vm3, %vm1461_vm4  ;;  %v389_v41 = vld [vmem:[%s1833_s2 + $0x8] sm:$0xff] (!%p304_p10) }
  0x16   : > { %s350_s19 = scalar_select %p349_p11, %s1445_s30, 1  ;;  %421 = vperm.xlu1 %1333, %v402_v11   ;;  %v846_v29 = vld [vmem:[%s1838_s7] sm:$0xf]  ;;  %v390_v42 = vld [vmem:[%s1833_s2 + $0x10] sm:$0xff]  ;;  %v391_v43 = vld [vmem:[%s1833_s2 + $0x18] sm:$0xff] }
  0x17   : > { %v388_v40 = vld [vmem:[%s1833_s2] sm:$0xff]  ;;  %v393_v45 = vld [vmem:[%s1833_s2 + $0x28] sm:$0xff]  ;;  %v394_v46 = vld [vmem:[%s1833_s2 + $0x30] sm:$0xff] }
  0x18   : > { %s1076_s20 = sshll.u32 %s350_s19, 3  ;;  %v392_v44 = vld [vmem:[%s1833_s2 + $0x20] sm:$0xff]  ;;  %v395_v47 = vld [vmem:[%s1833_s2 + $0x38] sm:$0xff]  ;;  %v397_v49 = vld [vmem:[%s1833_s2 + $0x48] sm:$0xff]  ;;  %s1043_s19 = sshll.u32 %s346_s16, 2 }
  0x19   : > { %s356_s23 = scalar_lea.vmem %s1831_s0, %s1076_s20  ;;  %s1078_s24 = sadd.s32 4, %s1076_s20  ;;  %v396_v48 = vld [vmem:[%s1833_s2 + $0x40] sm:$0xff]  ;;  %v398_v50 = vld [vmem:[%s1833_s2 + $0x50] sm:$0xff]  ;;  %v399_v51 = vld [vmem:[%s1833_s2 + $0x58] sm:$0xff] }
  0x1a   : > { %s365_s11 = scalar_lea.vmem %s1832_s1, %s1078_s24  ;;  %v1573_v1 = vld [vmem:[%s356_s23] sm:$0xf]  ;;  %431 = vperm.xlu1 %1333, %v404_v13   ;;  %s1073_s20 = sshll.u32 %s1445_s30, 6 }
  0x1b   : > { %v368_v2 = vld [vmem:[%s365_s11] sm:$0xf]  ;;  %v371_v3 = vrot.slane %v1573_v1, 4  ;;  %s348_s21 = scalar_lea.vmem [#allocation2], %s1043_s19  ;;  %s1784_s25 = scalar_lea.hbm %s1839_s8, %s1073_s20 }
  0x1c   : > { %v372_v4 = vrot.slane %v368_v2, 4  ;;  %v1328_v7 = vpack.i.bf16 %v368_v2, %v1573_v1  ;;  %v400_v52 = vld [vmem:[%s1833_s2 + $0x60] sm:$0xf]  ;;  %s946_s22 = sshll.u32 %s348_s21, 4  ;;  %s1462_s30 = smov [#allocation2]   ;;  %s1786_s22 = int_to_ptr.vmem [resolvable:$true] %s946_s22 }
  0x1d   : > { %s1375_s11 = scalar_lea.vmem %s1786_s22, 64 }
  0x1e   : > { %v1323_v6 = vpack.i.bf16 %v372_v4, %v371_v3  ;;  %436 = vperm.xlu1 %1333, %v405_v15   ;;  %p1376_p12 = scmp.ne.s32.totalorder %s1786_s22, %s1375_s11 }
  0x20   : > { %1324 = vrot.lane.b32.xlu0 %v1323_v6, %s1458_s12  ;;  %p1377_p13 = pnand %p1376_p12, %p1548_p4  ;;  %s1379_s12 = sshll.u32 %s1462_s30, 4  ;;  %s1380_s12 = int_to_ptr.vmem [resolvable:$false] %s1379_s12 }
  0x21   : > { %p1382_p1 = scmp.lt.s32.totalorder %s1786_s22, %s1380_s12 }
  0x22   : > { %446 = vperm.xlu1 %1333, %v407_v17   ;;  %p1378_p0 = pneg %p1377_p13 }
  0x24   : > { %1329 = vrot.lane.b32.xlu0 %v1328_v7, %s1459_s14  ;;  %s1381_s14 = scalar_lea.vmem %s1380_s12, 128 }
  0x25   : > { %p1383_p2 = scmp.lt.s32.totalorder %s1381_s14, %s1375_s11 }
  0x26   : > { %456 = vperm.xlu1 %1333, %v409_v19  }
  0x27   : > { %p1384_p3 = por %p1383_p2, %p1382_p1 }
  0x28   : > { %426 = vperm.xlu0 %1334, %v403_v10  }
  0x29   : > { %p1385_p5 = pnand %p1384_p3, %p1378_p0 }
  0x2a   : > { %466 = vperm.xlu1 %1333, %v411_v21  }
  0x2c   : > { %441 = vperm.xlu0 %1334, %v406_v12  }
  0x2e   : > { %476 = vperm.xlu1 %1333, %v413_v23  }
  0x30   : > { %451 = vperm.xlu0 %1334, %v408_v14  }
  0x32   : > { %685 = vperm.xlu1 %1333, %v672_v25  }
  0x34   : > { %461 = vperm.xlu0 %1334, %v410_v16  }
  0x36   : > { %695 = vperm.xlu1 %1333, %v674_v27  }
  0x38   : > { %471 = vperm.xlu0 %1334, %v412_v18  }
  0x3a   : > { %705 = vperm.xlu1 %1333, %v676_v28  }
  0x3c   : > { %680 = vperm.xlu0 %1334, %v671_v20  }
  0x3e   : > { %849 = vperm.xlu1 %1333, %v846_v29  }
  0x40   : > { %690 = vperm.xlu0 %1334, %v673_v22  }
  0x44   : > { %700 = vperm.xlu0 %1334, %v675_v24  }
  0x48   : > { %710 = vperm.xlu0 %1334, %v677_v26  }
  0x91   : > { %v417_v53 = vpop.permute.xlu1 %416 }
  0x92   : > { %v1325_v30 = vpop.permute.xlu0 %1324 }
  0x93   : > { %v1327_v31 = vunpack.i.h.bf16 %v1325_v30  ;;  %v1326_v32 = vunpack.i.l.bf16 %v1325_v30 }
  0x95   : > { %v378_v33 = vsel %vm377_vm1, %v1326_v32, %v1327_v31  ;;  %v422_v57 = vpop.permute.xlu1 %421 }
  0x96   : > { %v1330_v34 = vpop.permute.xlu0 %1329  ;;  %v387_v38 = vsel %vm386_vm3, %v1573_v1, %v378_v33 }
  0x97   : > { %v1332_v35 = vunpack.i.h.bf16 %v1330_v34  ;;  %v1331_v36 = vunpack.i.l.bf16 %v1330_v34 }
  0x99   : > { %v385_v37 = vsel %vm384_vm2, %v1331_v36, %v1332_v35  ;;  %v432_v2 = vpop.permute.xlu1 %431 }
  0x9a   : > { %v1231_v39 = vpack.c.bf16 %v385_v37, %v387_v38 }
  0x9c   : > { %1233 = vmatpush3.bf16.msk.msra.mxu0 %vm1232_vm5, %v1231_v39 }
  0x9d   : > { %v437_v10 = vpop.permute.xlu1 %436 }
  0x9f   : > { %1128 = vmatmul.mubr.msk.f32.vlgmr.msra.gmra.mrb[0].mxu0 %vm479_vm6, %v388_v40 }
  0xa0   : > { %1130 = vmatprep.mubr.msk.f32.mxu0 %vm1456_vm0, %v1457_v5 }
  0xa1   : > { %v447_v21 = vpop.permute.xlu1 %446 }
  0xa3   : > { %1131 = vmatmul.mubr.msk.f32.gmra.mrb[2].mxu0 %vm479_vm6, %v389_v41 }
  0xa4   : > { %1133 = vmatprep.mubr.msk.f32.mxu0 %vm1456_vm0, %v1457_v5 }
  0xa5   : > { %v457_v32 = vpop.permute.xlu1 %456 }
  0xa7   : > { %1134 = vmatmul.mubr.msk.f32.gmra.mrb[4].mxu0 %vm479_vm6, %v390_v42  ;;  %v427_v62 = vpop.permute.xlu0 %426 }
  0xa8   : > { %1136 = vmatprep.mubr.msk.f32.mxu0 %vm1456_vm0, %v1457_v5 }
  0xab   : > { %1137 = vmatmul.mubr.msk.f32.gmra.mrb[6].mxu0 %vm479_vm6, %v391_v43  ;;  %v442_v14 = vpop.permute.xlu0 %441  ;;  %v467_v43 = vpop.permute.xlu1 %466 }
  0xac   : > { %1139 = vmatprep.mubr.msk.f32.mxu0 %vm1456_vm0, %v1457_v5 }
  0xaf   : > { %1140 = vmatmul.mubr.msk.f32.gmra.mrb[8].mxu0 %vm479_vm6, %v392_v44  ;;  %v452_v25 = vpop.permute.xlu0 %451 }
  0xb0   : > { %1142 = vmatprep.mubr.msk.f32.mxu0 %vm1456_vm0, %v1457_v5 }
  0xb3   : > { %1143 = vmatmul.mubr.msk.f32.gmra.mrb[10].mxu0 %vm479_vm6, %v393_v45  ;;  %v462_v36 = vpop.permute.xlu0 %461 }
  0xb4   : > { %1145 = vmatprep.mubr.msk.f32.mxu0 %vm1456_vm0, %v1457_v5 }
  0xb7   : > { %1146 = vmatmul.mubr.msk.f32.gmra.mrb[12].mxu0 %vm479_vm6, %v394_v46 }
  0xb8   : > { %1148 = vmatprep.mubr.msk.f32.mxu0 %vm1456_vm0, %v1457_v5 }
  0xbb   : > { %1149 = vmatmul.mubr.msk.f32.gmra.mrb[14].mxu0 %vm479_vm6, %v395_v47  ;;  %v472_v47 = vpop.permute.xlu0 %471 }
  0xbc   : > { %1151 = vmatprep.mubr.msk.f32.mxu0 %vm1456_vm0, %v1457_v5 }
  0xbf   : > { %1152 = vmatmul.mubr.msk.f32.gmra.mrb[16].mxu0 %vm479_vm6, %v396_v48 }
  0xc0   : > { %1154 = vmatprep.mubr.msk.f32.mxu0 %vm1456_vm0, %v1457_v5 }
  0xc3   : > { %1155 = vmatmul.mubr.msk.f32.gmra.mrb[18].mxu0 %vm479_vm6, %v397_v49 }
  0xc4   : > { %1157 = vmatprep.mubr.msk.f32.mxu0 %vm1456_vm0, %v1457_v5 }
  0xc7   : > { %1158 = vmatmul.mubr.msk.f32.gmra.mrb[20].mxu0 %vm479_vm6, %v398_v50 }
  0xc8   : > { %1160 = vmatprep.mubr.msk.f32.mxu0 %vm1456_vm0, %v1457_v5 }
  0xcb   : > { %1161 = vmatmul.mubr.msk.f32.gmra.mrb[22].mxu0 %vm479_vm6, %v399_v51 }
  0xcc   : > { %1163 = vmatprep.mubr.msk.f32.mxu0 %vm1456_vm0, %v1457_v5 }
  0xcf   : > { %1164 = vmatmul.mubr.msk.f32.gmra.mrb[24].mxu0 %vm479_vm6, %v400_v52  ;;  %v477_v52 = vpop.permute.xlu1 %476 }
 0x172   : > { %v587_v54 = vpop.f32.mrb[0].mxu0 }
 0x173   : > { %v1129_v55 = vpop.f32.mrb[1].mxu0  ;;  %v588_v56 = vadd.f32 %v587_v54, %v417_v53 }
 0x175   : > { %1335 = vtanh.f32 %v588_v56 }
 0x176   : > { %v592_v58 = vpop.f32.mrb[2].mxu0 }
 0x177   : > { %v593_v59 = vadd.f32 %v592_v58, %v422_v57  ;;  %v1132_v60 = vpop.f32.mrb[3].mxu0 }
 0x179   : > { %1337 = vtanh.f32 %v593_v59 }
 0x17a   : > { %v597_v61 = vpop.f32.mrb[4].mxu0 }
 0x17b   : > { %v1135_v63 = vpop.f32.mrb[5].mxu0  ;;  %v598_v1 = vadd.f32 %v597_v61, %v427_v62  ;;  %v664_v61 = vld [vmem:[%s1835_s4] sm:$0xff] }
 0x17c   : > { %v665_v63 = vld [vmem:[%s1835_s4 + $0x8] sm:$0xff] }
 0x17d   : > { %1339 = vtanh.f32 %v598_v1  ;;  %v666_v1 = vld [vmem:[%s1835_s4 + $0x10] sm:$0xff] }
 0x17e   : > { %v602_v3 = vpop.f32.mrb[6].mxu0 }
 0x17f   : > { %v603_v4 = vadd.f32 %v602_v3, %v432_v2  ;;  %v1138_v6 = vpop.f32.mrb[7].mxu0  ;;  %v1336_v7 = vpop.eup %1335  ;;  %v667_v2 = vld [vmem:[%s1835_s4 + $0x18] sm:$0xff]  ;;  %v668_v3 = vld [vmem:[%s1835_s4 + $0x20] sm:$0xff] }
 0x180   : > { %v670_v6 = vld [vmem:[%s1835_s4 + $0x30] sm:$0x3] }
 0x181   : > { %1341 = vtanh.f32 %v603_v4  ;;  %v669_v4 = vld [vmem:[%s1835_s4 + $0x28] sm:$0xff] }
 0x182   : > { %v607_v8 = vpop.f32.mrb[8].mxu0 }
 0x183   : > { %v1338_v9 = vpop.eup %1337  ;;  %v1141_v11 = vpop.f32.mrb[9].mxu0  ;;  %v608_v12 = vadd.f32 %v607_v8, %v437_v10 }
 0x184   : > { %v1235_v13 = vpack.c.bf16 %v1338_v9, %v1336_v7  ;;  %v681_v8 = vpop.permute.xlu0 %680  ;;  %v686_v11 = vpop.permute.xlu1 %685 }
 0x185   : > { %1343 = vtanh.f32 %v608_v12 }
 0x186   : > { %v612_v15 = vpop.f32.mrb[10].mxu0  ;;  %1236 = vmatpush3.bf16.msra.mxu1 %v1235_v13 }
 0x187   : > { %v613_v16 = vadd.f32 %v612_v15, %v442_v14  ;;  %v1144_v17 = vpop.f32.mrb[11].mxu0  ;;  %1237 = vmatprep.subr.bf16.mxu1 %v1455_v0  ;;  %v1340_v18 = vpop.eup %1339 }
 0x189   : > { %1345 = vtanh.f32 %v613_v16  ;;  %v691_v16 = vpop.permute.xlu0 %690 }
 0x18a   : > { %v617_v19 = vpop.f32.mrb[12].mxu0 }
 0x18b   : > { %v1342_v20 = vpop.eup %1341  ;;  %v1147_v22 = vpop.f32.mrb[13].mxu0  ;;  %v618_v23 = vadd.f32 %v617_v19, %v447_v21 }
 0x18c   : > { %v1238_v24 = vpack.c.bf16 %v1342_v20, %v1340_v18  ;;  %v696_v19 = vpop.permute.xlu1 %695 }
 0x18d   : > { %1347 = vtanh.f32 %v618_v23 }
 0x18e   : > { %v622_v26 = vpop.f32.mrb[14].mxu0  ;;  %1239 = vmatpush3.bf16.msra.mxu1 %v1238_v24 }
 0x18f   : > { %v623_v27 = vadd.f32 %v622_v26, %v452_v25  ;;  %v1150_v28 = vpop.f32.mrb[15].mxu0  ;;  %1240 = vmatprep.subr.bf16.mxu1 %v1455_v0  ;;  %v1344_v29 = vpop.eup %1343 }
 0x190   : > { %v701_v26 = vpop.permute.xlu0 %700 }
 0x191   : > { %1349 = vtanh.f32 %v623_v27 }
 0x192   : > { %v627_v30 = vpop.f32.mrb[16].mxu0 }
 0x193   : > { %v1346_v31 = vpop.eup %1345  ;;  %v1153_v33 = vpop.f32.mrb[17].mxu0  ;;  %v628_v34 = vadd.f32 %v627_v30, %v457_v32 }
 0x194   : > { %v1241_v35 = vpack.c.bf16 %v1346_v31, %v1344_v29  ;;  %v706_v30 = vpop.permute.xlu1 %705 }
 0x195   : > { %1351 = vtanh.f32 %v628_v34 }
 0x196   : > { %v632_v37 = vpop.f32.mrb[18].mxu0  ;;  %1242 = vmatpush3.bf16.msra.mxu1 %v1241_v35  ;;  %v711_v35 = vpop.permute.xlu0 %710 }
 0x197   : > { %v633_v38 = vadd.f32 %v632_v37, %v462_v36  ;;  %v1156_v39 = vpop.f32.mrb[19].mxu0  ;;  %1243 = vmatprep.subr.bf16.mxu1 %v1455_v0  ;;  %v1348_v40 = vpop.eup %1347 }
 0x199   : > { %1353 = vtanh.f32 %v633_v38 }
 0x19a   : > { %v637_v41 = vpop.f32.mrb[20].mxu0 }
 0x19b   : > { %v1350_v42 = vpop.eup %1349  ;;  %v1159_v44 = vpop.f32.mrb[21].mxu0  ;;  %v638_v45 = vadd.f32 %v637_v41, %v467_v43 }
 0x19c   : > { %v1244_v46 = vpack.c.bf16 %v1350_v42, %v1348_v40  ;;  %v845_v44 = vld [vmem:[%s1837_s6] sm:$0xf] }
 0x19d   : > { %1355 = vtanh.f32 %v638_v45 }
 0x19e   : > { %v642_v48 = vpop.f32.mrb[22].mxu0  ;;  %1245 = vmatpush3.bf16.msra.mxu1 %v1244_v46 }
 0x19f   : > { %v643_v49 = vadd.f32 %v642_v48, %v472_v47  ;;  %v1162_v50 = vpop.f32.mrb[23].mxu0  ;;  %1246 = vmatprep.subr.bf16.mxu1 %v1455_v0  ;;  %v1352_v51 = vpop.eup %1351 }
 0x1a1   : > { %1357 = vtanh.f32 %v643_v49 }
 0x1a2   : > { %v647_v53 = vpop.f32.mrb[24].mxu0 }
 0x1a3   : > { %v1354_v54 = vpop.eup %1353  ;;  %v648_v55 = vadd.f32 %v647_v53, %v477_v52  ;;  %v1165_v56 = vpop.f32.mrb[25].mxu0 }
 0x1a4   : > { %v1247_v57 = vpack.c.bf16 %v1354_v54, %v1352_v51 }
 0x1a5   : > { %1359 = vtanh.f32 %v648_v55 }
 0x1a6   : > { %1248 = vmatpush3.bf16.msra.mxu1 %v1247_v57 }
 0x1a7   : > { %1249 = vmatprep.subr.bf16.mxu1 %v1455_v0  ;;  %v1356_v58 = vpop.eup %1355 }
 0x1ab   : > { %v1358_v59 = vpop.eup %1357 }
 0x1ac   : > { %v1250_v60 = vpack.c.bf16 %v1358_v59, %v1356_v58 }
 0x1ae   : > { %1251 = vmatpush3.bf16.msra.mxu1 %v1250_v60 }
 0x1af   : > { %1190 = vmatprep.subr.mxu1 %v1457_v5  ;;  %v1360_v62 = vpop.eup %1359 }
 0x1b2   : > { %1191 = vmatpush3.msk.msra.mxu1 %vm386_vm3, %v1360_v62 }
 0x1b3   : > { %1193 = vmatmul.mubr.msk.f32.vlgmr.msra.gmra.mrb[0].mxu1 %vm713_vm7, %v664_v61  ;;  %1252 = vmatprep.subr.bf16.mxu1 %v1455_v0 }
 0x1b4   : > { %1195 = vmatprep.mubr.msk.f32.mxu1 %vm1456_vm0, %v1457_v5 }
 0x1b7   : > { %1196 = vmatmul.mubr.msk.f32.gmra.mrb[2].mxu1 %vm713_vm7, %v665_v63 }
 0x1b8   : > { %1198 = vmatprep.mubr.msk.f32.mxu1 %vm1456_vm0, %v1457_v5 }
 0x1bb   : > { %1199 = vmatmul.mubr.msk.f32.gmra.mrb[4].mxu1 %vm713_vm7, %v666_v1 }
 0x1bc   : > { %1201 = vmatprep.mubr.msk.f32.mxu1 %vm1456_vm0, %v1457_v5 }
 0x1bf   : > { %1202 = vmatmul.mubr.msk.f32.gmra.mrb[6].mxu1 %vm713_vm7, %v667_v2 }
 0x1c0   : > { %1204 = vmatprep.mubr.msk.f32.mxu1 %vm1456_vm0, %v1457_v5 }
 0x1c3   : > { %1205 = vmatmul.mubr.msk.f32.gmra.mrb[8].mxu1 %vm713_vm7, %v668_v3 }
 0x1c4   : > { %1207 = vmatprep.mubr.msk.f32.mxu1 %vm1456_vm0, %v1457_v5 }
 0x1c7   : > { %1208 = vmatmul.mubr.msk.f32.gmra.mrb[10].mxu1 %vm713_vm7, %v669_v4 }
 0x1c8   : > { %1210 = vmatprep.mubr.msk.f32.mxu1 %vm1456_vm0, %v1457_v5 }
 0x1cb   : > { %1211 = vmatmul.mubr.msk.f32.gmra.mrb[12].mxu1 %vm713_vm7, %v670_v6 }
 0x1cc   : > { %1227 = vmatprep.mubr.msk.f32.mxu1 %vm1456_vm0, %v1457_v5 }
 0x286   : > { %v804_v7 = vpop.f32.mrb[0].mxu1 }
 0x287   : > { %v1194_v9 = vpop.f32.mrb[1].mxu1  ;;  %v805_v10 = vadd.f32 %v804_v7, %v681_v8 }
 0x289   : > { %1361 = vtanh.f32 %v805_v10 }
 0x28a   : > { %v809_v12 = vpop.f32.mrb[2].mxu1 }
 0x28b   : > { %v810_v13 = vadd.f32 %v809_v12, %v686_v11  ;;  %v1197_v14 = vpop.f32.mrb[3].mxu1 }
 0x28d   : > { %1363 = vtanh.f32 %v810_v13 }
 0x28e   : > { %v814_v15 = vpop.f32.mrb[4].mxu1 }
 0x28f   : > { %v1200_v17 = vpop.f32.mrb[5].mxu1  ;;  %v815_v18 = vadd.f32 %v814_v15, %v691_v16 }
 0x291   : > { %1365 = vtanh.f32 %v815_v18 }
 0x292   : > { %v819_v20 = vpop.f32.mrb[6].mxu1 }
 0x293   : > { %v820_v21 = vadd.f32 %v819_v20, %v696_v19  ;;  %v1203_v22 = vpop.f32.mrb[7].mxu1  ;;  %v1362_v23 = vpop.eup %1361 }
 0x295   : > { %1367 = vtanh.f32 %v820_v21 }
 0x296   : > { %v824_v24 = vpop.f32.mrb[8].mxu1 }
 0x297   : > { %v1364_v25 = vpop.eup %1363  ;;  %v1206_v27 = vpop.f32.mrb[9].mxu1  ;;  %v825_v28 = vadd.f32 %v824_v24, %v701_v26 }
 0x298   : > { %v1253_v29 = vpack.c.bf16 %v1364_v25, %v1362_v23 }
 0x299   : > { %1369 = vtanh.f32 %v825_v28 }
 0x29a   : > { %v829_v31 = vpop.f32.mrb[10].mxu1  ;;  %1254 = vmatpush3.bf16.msra.mxu1 %v1253_v29 }
 0x29b   : > { %v830_v32 = vadd.f32 %v829_v31, %v706_v30  ;;  %v1209_v33 = vpop.f32.mrb[11].mxu1  ;;  %1255 = vmatprep.subr.bf16.mxu1 %v1455_v0  ;;  %v1366_v34 = vpop.eup %1365 }
 0x29d   : > { %1371 = vtanh.f32 %v830_v32 }
 0x29e   : > { %v834_v36 = vpop.f32.mrb[12].mxu1 }
 0x29f   : > { %v1368_v37 = vpop.eup %1367  ;;  %v835_v38 = vadd.f32 %v834_v36, %v711_v35  ;;  %v1212_v39 = vpop.f32.mrb[13].mxu1 }
 0x2a0   : > { %v1256_v40 = vpack.c.bf16 %v1368_v37, %v1366_v34 }
 0x2a1   : > { %1373 = vtanh.f32 %v835_v38 }
 0x2a2   : > { %1257 = vmatpush3.bf16.msra.mxu1 %v1256_v40 }
 0x2a3   : > { %1258 = vmatprep.subr.bf16.mxu1 %v1455_v0  ;;  %v1370_v41 = vpop.eup %1369  ;;  %v850_v0 = vpop.permute.xlu1 %849 }
 0x2a7   : > { %v1372_v42 = vpop.eup %1371 }
 0x2a8   : > { %v1259_v43 = vpack.c.bf16 %v1372_v42, %v1370_v41 }
 0x2aa   : > { %1260 = vmatpush3.bf16.msra.mxu1 %v1259_v43 }
 0x2ab   : > { %1225 = vmatprep.subr.mxu1 %v1457_v5  ;;  %v1374_v45 = vpop.eup %1373 }
 0x2ae   : > { %1226 = vmatpush3.msk.msra.mxu1 %vm856_vm8, %v1374_v45 }
 0x2af   : > { %1228 = vmatmul.mubr.msk.f32.vlgmr.msra.gmra.mrb[14].mxu1 %vm852_vm9, %v845_v44 }
 0x382   : > { %v926_v46 = vpop.f32.mrb[14].mxu1 }
 0x383   : > { %v927_v47 = vadd.f32 %v926_v46, %v850_v0  ;;  %v1229_v48 = vpop.f32.mrb[15].mxu1 }
 0x385   : > { %930 = vst [vmem:[%s348_s21] sm:$0xf] %v927_v47 }
 0x386   : > { %1388 = shalt.err (!%p1385_p5)
}
 0x387   : > { %s1389_s16 = scalar_lea.hbm %s1784_s25, 64  ;;  %s1393_s21 = scalar_lea.hbm %s1839_s8, 128 }
 0x388   : > { %p1390_p6 = scmp.ne.s32.totalorder %s1784_s25, %s1389_s16  ;;  %p1394_p10 = scmp.lt.u32.totalorder %s1784_s25, %s1839_s8 }
 0x389   : > { %p1395_p11 = scmp.lt.u32.totalorder %s1393_s21, %s1389_s16  ;;  %p1397_p13 = scmp.lt.u32.totalorder %s1389_s16, %s1784_s25 }
 0x38a   : > { %p1391_p7 = pnand %p1390_p6, %p1548_p4 }
 0x38b   : > { %p1396_p12 = por %p1395_p11, %p1394_p10 }
 0x38c   : > { %p1392_p9 = pneg %p1391_p7 }
 0x38d   : > { %p1398_p0 = por %p1397_p13, %p1396_p12 }
 0x38f   : > { %p1399_p1 = pnand %p1398_p0, %p1392_p9 }
 0x391   : > { %1402 = shalt.err (!%p1399_p1)
}
 0x392   : > { %1261 = dma.vmem_to_hbm [thread:$0]  (%p1548_p4), %s1786_s22, 64, %s1784_s25, %s932_s26  }
 0x393 PF: > { %p1267_p2 = scmp.ge.s32.totalorder %s1453_s10, 2  ;;  %s958_s11 = sand.u32 1, %s1433_s27  }
 0x394   : > { %s959_s30 = scalar_lea.sflag [#allocation3], %s958_s11 }
 0x395   : > { %p1264_p3 = pnand %p1267_p2, %p1555_p8 }
 0x397   : > { %1428 = dma.done.wait (!%p1264_p3), %s959_s30, 64  }
 0x398   : > { %1430 = vsyncadd (!%p1264_p3), %s959_s30, 4294967232  ;;  %s21_s10 = sadd.s32 1, %s1453_s10   ;;  %s1842_s27 = smov %s1437_s28 }
 0x399   : > { %p18_p5 = scmp.ge.s32.totalorder %s21_s10, 4   ;;  %s1843_s28 = smov %s1441_s29 }
 0x39a   : > { %s1844_s29 = smov %s1561_s18  ;;  %s1845_s30 = smov %s1449_s9 }
 0x39b   : > { %s1846_s9 = smov %s1848_s13  ;;  %20 = sbr.rel (!%p18_p5) target bundleno = 4 (0x4), region = 90 }
 0x3a2   :  { %964 = vsyncpa [#allocation3], 1 }
 0x3a3   :  { %966 = vsyncpa [#allocation3 + $0x1], 1 }

</bundles_post_ra>
